<compile_context>
chip_gen: v6e
topology: v6e:2x2x1
jax: 0.10.0
libtpu: 0.0.40
codegen_flags: <defaults>
</compile_context>

<pallas_src>
import functools

import numpy as np
import jax
import jax.numpy as jnp
from jax.experimental import pallas as pl
from jax.experimental.pallas import tpu as pltpu

OUT_CHANNELS = 256
BN_EPS = 1e-5
_LOW_PAD = 128          # low-level projected channels (48) lane-padded to 128
_TILE_TARGET_M = 512    # target rows*W per spatial tile


def _vmem_limit_bytes():
    """Generation-aware scoped-VMEM cap: ~96 MiB on v5e/v6e, ~48 MiB on v7x."""
    try:
        cap = int(pltpu.get_tpu_info().vmem_capacity_bytes)
    except Exception:
        cap = 128 * 1024 * 1024
    return int(min(96 * 1024 * 1024, (cap * 3) // 4))


def _compiler_params(sem):
    return pltpu.CompilerParams(dimension_semantics=sem,
                                vmem_limit_bytes=_vmem_limit_bytes())


def _row_tile(H, W, target=_TILE_TARGET_M):
    """cdiv row tiling: th rows per tile so th*W ~ target; callers pad H to th*nh."""
    th = max(1, min(H, target // max(W, 1)))
    nh = -(-H // th)
    return th, nh


def _cin_chunk(cin, cap=256):
    """Largest chunk <= cap that divides cin (powers-of-two fallback)."""
    if cin <= cap:
        return cin
    tk = cap
    while tk > 1 and cin % tk:
        tk //= 2
    return max(tk, 1)


# --------------------------------------------------------------------------
# Kernel 1: fused ASPP (1x1 + three dilated 3x3 + pooling branch) + 1x1
#           projection + BN + ReLU, with a Cin-reduction grid axis.
# --------------------------------------------------------------------------
def _fused_aspp_kernel(x_ref, w0_ref, wd0_ref, wd1_ref, wd2_ref, wpool_ref,
                       sbr_ref, bbr_ref, wpr_ref, sp_ref, bp_ref,
                       o_ref, acc_ref, pacc_ref, *,
                       H, W, oc, tk, dils, maxd, inv_hw):
    k = pl.program_id(1)
    nk = pl.num_programs(1)
    M = H * W

    @pl.when(k == 0)
    def _():
        acc_ref[...] = jnp.zeros_like(acc_ref)
        pacc_ref[...] = jnp.zeros_like(pacc_ref)

    def tap(r, c):
        # static window of the once-padded image chunk, flattened to (H*W, tk)
        return x_ref[0, r:r + H, c:c + W, :].reshape(M, tk)

    # ---- branch 0: 1x1 conv partial sum over this Cin chunk
    xc = tap(maxd, maxd)
    acc_ref[0] += jnp.dot(xc, w0_ref[...], preferred_element_type=jnp.float32)

    # ---- pooling branch partial: spatial mean of this chunk -> Wpool chunk
    mean_c = jnp.sum(xc.astype(jnp.float32), axis=0, keepdims=True) * inv_hw
    pacc_ref[...] += jnp.dot(mean_c.astype(jnp.bfloat16), wpool_ref[...],
                             preferred_element_type=jnp.float32)

    # ---- branches 1..3: dilated 3x3 convs, partial sums over this Cin chunk
    for bi, (d, wd_ref) in enumerate(zip(dils, (wd0_ref, wd1_ref, wd2_ref))):
        yb = jnp.dot(tap(maxd - d, maxd - d), wd_ref[0],
                     preferred_element_type=jnp.float32)
        for t in range(1, 9):
            dy, dx = divmod(t, 3)
            yb = yb + jnp.dot(tap(maxd + (dy - 1) * d, maxd + (dx - 1) * d),
                              wd_ref[t], preferred_element_type=jnp.float32)
        acc_ref[bi + 1] += yb

    # ---- finalize: per-branch BN+ReLU, 1x1 projection, projection BN+ReLU
    @pl.when(k == nk - 1)
    def _():
        yp = jnp.maximum(pacc_ref[...] * sbr_ref[4] + bbr_ref[4], 0.0)   # (1, oc)
        out = jnp.dot(yp.astype(jnp.bfloat16), wpr_ref[4],
                      preferred_element_type=jnp.float32)                # (1, oc)
        for bi in range(4):
            yb = jnp.maximum(acc_ref[bi] * sbr_ref[bi] + bbr_ref[bi], 0.0)
            out = out + jnp.dot(yb.astype(jnp.bfloat16), wpr_ref[bi],
                                preferred_element_type=jnp.float32)      # (M, oc)
        y = jnp.maximum(out * sp_ref[...] + bp_ref[...], 0.0)
        o_ref[...] = y.reshape(1, H, W, oc).astype(o_ref.dtype)


def fused_aspp_project(x_bf16, P, dils):
    N, H, W, Cin = x_bf16.shape
    oc = OUT_CHANNELS
    maxd = max(dils)
    tk = _cin_chunk(Cin)
    nk = Cin // tk

    xp = jnp.pad(x_bf16, ((0, 0), (maxd, maxd), (maxd, maxd), (0, 0)))
    Hp, Wp = H + 2 * maxd, W + 2 * maxd

    w0 = P["aspp0_w"].reshape(Cin, oc).astype(jnp.bfloat16)
    wd = [P[f"aspp{i + 1}_w"].reshape(9, Cin, oc).astype(jnp.bfloat16)
          for i in range(3)]
    wpool = P["aspp_pool_w"].reshape(Cin, oc).astype(jnp.bfloat16)
    sbr = jnp.stack([P["aspp0_s"], P["aspp1_s"], P["aspp2_s"], P["aspp3_s"],
                     P["aspp_pool_s"]]).astype(jnp.float32)
    bbr = jnp.stack([P["aspp0_b"], P["aspp1_b"], P["aspp2_b"], P["aspp3_b"],
                     P["aspp_pool_b"]]).astype(jnp.float32)
    wpr = P["proj_w"].reshape(5, oc, oc).astype(jnp.bfloat16)
    sp = P["proj_s"].reshape(1, oc).astype(jnp.float32)
    bp = P["proj_b"].reshape(1, oc).astype(jnp.float32)

    kern = functools.partial(_fused_aspp_kernel, H=H, W=W, oc=oc, tk=tk,
                             dils=tuple(dils), maxd=maxd, inv_hw=1.0 / (H * W))
    return pl.pallas_call(
        kern,
        out_shape=jax.ShapeDtypeStruct((N, H, W, oc), jnp.bfloat16),
        grid=(N, nk),
        in_specs=[
            pl.BlockSpec((1, Hp, Wp, tk), lambda n, k: (n, 0, 0, k)),
            pl.BlockSpec((tk, oc), lambda n, k: (k, 0)),
            pl.BlockSpec((9, tk, oc), lambda n, k: (0, k, 0)),
            pl.BlockSpec((9, tk, oc), lambda n, k: (0, k, 0)),
            pl.BlockSpec((9, tk, oc), lambda n, k: (0, k, 0)),
            pl.BlockSpec((tk, oc), lambda n, k: (k, 0)),
            pl.BlockSpec((5, oc), lambda n, k: (0, 0)),
            pl.BlockSpec((5, oc), lambda n, k: (0, 0)),
            pl.BlockSpec((5, oc, oc), lambda n, k: (0, 0, 0)),
            pl.BlockSpec((1, oc), lambda n, k: (0, 0)),
            pl.BlockSpec((1, oc), lambda n, k: (0, 0)),
        ],
        out_specs=pl.BlockSpec((1, H, W, oc), lambda n, k: (n, 0, 0, 0)),
        scratch_shapes=[pltpu.VMEM((4, H * W, oc), jnp.float32),
                        pltpu.VMEM((1, oc), jnp.float32)],
        compiler_params=_compiler_params(("parallel", "arbitrary")),
    )(xp, w0, wd[0], wd[1], wd[2], wpool, sbr, bbr, wpr, sp, bp)


# --------------------------------------------------------------------------
# Kernel 2: low-level 1x1 conv + BN + ReLU, channels lane-padded 48 -> 128
# --------------------------------------------------------------------------
def _low_proj_kernel(x_ref, w_ref, s_ref, b_ref, o_ref, *, th, W, Cin, Cout):
    M = th * W
    x = x_ref[0].reshape(M, Cin)
    y = jnp.dot(x, w_ref[...], preferred_element_type=jnp.float32)
    y = jnp.maximum(y * s_ref[...] + b_ref[...], 0.0)
    o_ref[...] = y.reshape(1, th, W, Cout).astype(o_ref.dtype)


def low_level_project(low_bf16, P):
    N, H, W, Cin = low_bf16.shape
    Cr = P["low_w"].shape[-1]                       # 48 real channels
    Cout = _LOW_PAD
    th, nh = _row_tile(H, W)
    Hpad = th * nh
    xin = low_bf16
    if Hpad != H:
        xin = jnp.pad(xin, ((0, 0), (0, Hpad - H), (0, 0), (0, 0)))
    w = jnp.zeros((Cin, Cout), jnp.float32).at[:, :Cr].set(
        P["low_w"].reshape(Cin, Cr)).astype(jnp.bfloat16)
    s = jnp.zeros((1, Cout), jnp.float32).at[:, :Cr].set(P["low_s"].reshape(1, Cr))
    b = jnp.zeros((1, Cout), jnp.float32).at[:, :Cr].set(P["low_b"].reshape(1, Cr))
    kern = functools.partial(_low_proj_kernel, th=th, W=W, Cin=Cin, Cout=Cout)
    out = pl.pallas_call(
        kern,
        out_shape=jax.ShapeDtypeStruct((N, Hpad, W, Cout), jnp.bfloat16),
        grid=(N, nh),
        in_specs=[
            pl.BlockSpec((1, th, W, Cin), lambda n, h: (n, h, 0, 0)),
            pl.BlockSpec((Cin, Cout), lambda n, h: (0, 0)),
            pl.BlockSpec((1, Cout), lambda n, h: (0, 0)),
            pl.BlockSpec((1, Cout), lambda n, h: (0, 0)),
        ],
        out_specs=pl.BlockSpec((1, th, W, Cout), lambda n, h: (n, h, 0, 0)),
        compiler_params=_compiler_params(("parallel", "parallel")),
    )(xin, w, s, b)
    return out[:, :H] if Hpad != H else out


# --------------------------------------------------------------------------
# Kernel 3: classifier: 3x3 conv over split [low48 | up] inputs (no concat)
#           + BN + ReLU + 1x1 classifier (+bias); output lane-padded to 128
# --------------------------------------------------------------------------
def _classifier_kernel(low_ref, up_ref, w3l_ref, w3u_ref, s_ref, b_ref,
                       wc_ref, bc_ref, o_ref, *, th, W, Cl, Cu, Cpad):
    h = pl.program_id(1)
    r0 = h * th
    M = th * W
    acc = None
    for t in range(9):
        dy, dx = divmod(t, 3)
        lp = low_ref[0, pl.ds(r0 + dy, th), pl.ds(dx, W), :].reshape(M, Cl)
        uq = up_ref[0, pl.ds(r0 + dy, th), pl.ds(dx, W), :].reshape(M, Cu)
        part = jnp.dot(lp, w3l_ref[t], preferred_element_type=jnp.float32)
        part = part + jnp.dot(uq, w3u_ref[t], preferred_element_type=jnp.float32)
        acc = part if acc is None else acc + part
    y = jnp.maximum(acc * s_ref[...] + b_ref[...], 0.0)
    logits = jnp.dot(y.astype(jnp.bfloat16), wc_ref[...],
                     preferred_element_type=jnp.float32) + bc_ref[...]
    o_ref[...] = logits.reshape(1, th, W, Cpad)


def classifier_head(low48p, up, P):
    N, H, W, Cl = low48p.shape
    Cu = up.shape[-1]
    Cmid = P["cls3_w"].shape[-1]
    Cr = P["low_w"].shape[-1]                       # 48 real low channels
    nc = P["cls1_w"].shape[-1]
    Cpad = ((nc + 127) // 128) * 128
    th, nh = _row_tile(H, W)
    Hpad = th * nh
    lowp = jnp.pad(low48p, ((0, 0), (1, 1 + Hpad - H), (1, 1), (0, 0)))
    upp = jnp.pad(up, ((0, 0), (1, 1 + Hpad - H), (1, 1), (0, 0)))
    Hh, Wh = Hpad + 2, W + 2

    w3 = P["cls3_w"].reshape(9, Cr + Cu, Cmid)
    w3l = jnp.zeros((9, Cl, Cmid), jnp.float32).at[:, :Cr, :].set(
        w3[:, :Cr, :]).astype(jnp.bfloat16)
    w3u = w3[:, Cr:, :].astype(jnp.bfloat16)
    s3 = P["cls3_s"].reshape(1, Cmid).astype(jnp.float32)
    b3 = P["cls3_b"].reshape(1, Cmid).astype(jnp.float32)
    wc = jnp.zeros((Cmid, Cpad), jnp.float32).at[:, :nc].set(
        P["cls1_w"].reshape(Cmid, nc)).astype(jnp.bfloat16)
    bc = jnp.zeros((1, Cpad), jnp.float32).at[:, :nc].set(
        P["cls1_bias"].reshape(1, nc))

    kern = functools.partial(_classifier_kernel, th=th, W=W, Cl=Cl, Cu=Cu,
                             Cpad=Cpad)
    out = pl.pallas_call(
        kern,
        out_shape=jax.ShapeDtypeStruct((N, Hpad, W, Cpad), jnp.float32),
        grid=(N, nh),
        in_specs=[
            pl.BlockSpec((1, Hh, Wh, Cl), lambda n, h: (n, 0, 0, 0)),
            pl.BlockSpec((1, Hh, Wh, Cu), lambda n, h: (n, 0, 0, 0)),
            pl.BlockSpec((9, Cl, Cmid), lambda n, h: (0, 0, 0)),
            pl.BlockSpec((9, Cu, Cmid), lambda n, h: (0, 0, 0)),
            pl.BlockSpec((1, Cmid), lambda n, h: (0, 0)),
            pl.BlockSpec((1, Cmid), lambda n, h: (0, 0)),
            pl.BlockSpec((Cmid, Cpad), lambda n, h: (0, 0)),
            pl.BlockSpec((1, Cpad), lambda n, h: (0, 0)),
        ],
        out_specs=pl.BlockSpec((1, th, W, Cpad), lambda n, h: (n, h, 0, 0)),
        compiler_params=_compiler_params(("parallel", "parallel")),
    )(lowp, upp, w3l, w3u, s3, b3, wc, bc)
    return out[:, :H, :, :nc]


# --------------------------------------------------------------------------
# Bilinear upsample (align_corners=False), PyTorch F.interpolate semantics
# --------------------------------------------------------------------------
def _interp_matrix(out_size, in_size):
    o = np.arange(out_size, dtype=np.float64)
    src = (o + 0.5) * (in_size / out_size) - 0.5
    src = np.clip(src, 0.0, in_size - 1)
    lo = np.floor(src).astype(np.int64)
    hi = np.minimum(lo + 1, in_size - 1)
    w_hi = src - lo
    mat = np.zeros((out_size, in_size), dtype=np.float32)
    mat[np.arange(out_size), lo] += (1.0 - w_hi)
    mat[np.arange(out_size), hi] += w_hi
    return jnp.asarray(mat)


def bilinear_resize_nhwc(x, out_h, out_w, precision=None):
    # TODO(synk): bilinear F.interpolate stays in XLA (small memory-bound
    #             gather/lerp); not lowered to a Pallas kernel.
    n, hi, wi, c = x.shape
    if (hi, wi) == (out_h, out_w):
        return x
    rh = _interp_matrix(out_h, hi)
    rw = _interp_matrix(out_w, wi)
    return jnp.einsum("nhwc,Hh,Ww->nHWc", x, rh, rw, precision=precision)


# --------------------------------------------------------------------------
# Parameter initialization (matches __init__ shapes; BN in inference mode)
# --------------------------------------------------------------------------
def _kaiming_conv(key, cout, cin, kh, kw):
    fan_in = cin * kh * kw
    std = (2.0 / fan_in) ** 0.5
    w_oihw = jax.random.normal(key, (cout, cin, kh, kw), jnp.float32) * std
    return jnp.transpose(w_oihw, (2, 3, 1, 0))            # -> HWIO


def _bn_fold(c, eps=BN_EPS):
    gamma = jnp.ones((c,), jnp.float32)
    beta = jnp.zeros((c,), jnp.float32)
    mean = jnp.zeros((c,), jnp.float32)
    var = jnp.ones((c,), jnp.float32)
    scale = gamma / jnp.sqrt(var + eps)
    bias = beta - mean * scale
    return scale, bias


def init_deeplab_v3plus(key, in_channels, low_level_channels, num_classes):
    oc = OUT_CHANNELS
    keys = jax.random.split(key, 12)
    P = {}
    P["low_w"] = _kaiming_conv(keys[0], 48, low_level_channels, 1, 1)
    P["low_s"], P["low_b"] = _bn_fold(48)
    P["aspp0_w"] = _kaiming_conv(keys[1], oc, in_channels, 1, 1)
    P["aspp0_s"], P["aspp0_b"] = _bn_fold(oc)
    for i in range(3):
        P[f"aspp{i+1}_w"] = _kaiming_conv(keys[2 + i], oc, in_channels, 3, 3)
        P[f"aspp{i+1}_s"], P[f"aspp{i+1}_b"] = _bn_fold(oc)
    P["aspp_pool_w"] = _kaiming_conv(keys[5], oc, in_channels, 1, 1)
    P["aspp_pool_s"], P["aspp_pool_b"] = _bn_fold(oc)
    P["proj_w"] = _kaiming_conv(keys[6], oc, 5 * oc, 1, 1)
    P["proj_s"], P["proj_b"] = _bn_fold(oc)
    P["cls3_w"] = _kaiming_conv(keys[7], oc, 48 + oc, 3, 3)
    P["cls3_s"], P["cls3_b"] = _bn_fold(oc)
    P["cls1_w"] = _kaiming_conv(keys[8], num_classes, oc, 1, 1)
    P["cls1_bias"] = jax.random.normal(keys[9], (num_classes,), jnp.float32) * 0.01
    return P


# --------------------------------------------------------------------------
# Forward pass (glue in JAX, compute in Pallas)
# --------------------------------------------------------------------------
def deeplab_head_v3plus_forward(feature, P, aspp_dilate=(12, 24, 36)):
    x = jnp.transpose(feature["out"], (0, 2, 3, 1)).astype(jnp.bfloat16)
    low = jnp.transpose(feature["low_level"], (0, 2, 3, 1)).astype(jnp.bfloat16)

    # low-level 1x1 projection -> (N, Hl, Wl, 128) bf16 (48 real + 80 zero ch)
    low48p = low_level_project(low, P)

    # fused ASPP: 4 spatial branches + pooling branch + 1x1 projection,
    # Cin-chunked reduction grid, bf16 output.
    aspp = fused_aspp_project(x, P, tuple(aspp_dilate))
    # TODO(synk): nn.Dropout(0.1) in ASPP.project treated as inference-mode identity.

    # bilinear upsample to the low-level spatial size (XLA, bf16 intermediates)
    up = bilinear_resize_nhwc(aspp, low48p.shape[1],
                              low48p.shape[2]).astype(jnp.bfloat16)

    # classifier: 3x3 conv over split [low48 | up] inputs + BN + ReLU + 1x1(+bias)
    logits = classifier_head(low48p, up, P)
    return jnp.transpose(logits, (0, 3, 1, 2))             # back to NCHW


# --------------------------------------------------------------------------
# Pure-JAX f32 reference for validation
# --------------------------------------------------------------------------
def _ref_cba(x, w, s, b, dil, relu=True):
    pad = dil * (w.shape[0] // 2)
    y = jax.lax.conv_general_dilated(
        x, w, window_strides=(1, 1), padding=((pad, pad), (pad, pad)),
        rhs_dilation=(dil, dil), dimension_numbers=("NHWC", "HWIO", "NHWC"),
        precision=jax.lax.Precision.HIGHEST)
    y = y * s + b
    return jnp.maximum(y, 0.0) if relu else y


def ref_forward(feature, P, aspp_dilate=(12, 24, 36)):
    x = jnp.transpose(feature["out"], (0, 2, 3, 1)).astype(jnp.float32)
    low = jnp.transpose(feature["low_level"], (0, 2, 3, 1)).astype(jnp.float32)
    N, H, W, _ = x.shape
    low48 = _ref_cba(low, P["low_w"], P["low_s"], P["low_b"], 1)
    br = [_ref_cba(x, P["aspp0_w"], P["aspp0_s"], P["aspp0_b"], 1)]
    for i, d in enumerate(aspp_dilate):
        br.append(_ref_cba(x, P[f"aspp{i+1}_w"], P[f"aspp{i+1}_s"],
                           P[f"aspp{i+1}_b"], d))
    pooled = jnp.mean(x, axis=(1, 2), keepdims=True)
    p = _ref_cba(pooled, P["aspp_pool_w"], P["aspp_pool_s"], P["aspp_pool_b"], 1)
    br.append(jnp.broadcast_to(p, (N, H, W, OUT_CHANNELS)))
    cat = jnp.concatenate(br, axis=-1)
    proj = _ref_cba(cat, P["proj_w"], P["proj_s"], P["proj_b"], 1)
    up = bilinear_resize_nhwc(proj, low48.shape[1], low48.shape[2],
                              precision=jax.lax.Precision.HIGHEST)
    cat2 = jnp.concatenate([low48, up], axis=-1)
    y = _ref_cba(cat2, P["cls3_w"], P["cls3_s"], P["cls3_b"], 1)
    nc = P["cls1_w"].shape[-1]
    out = _ref_cba(y, P["cls1_w"], jnp.ones((nc,), jnp.float32),
                   P["cls1_bias"], 1, relu=False)
    return jnp.transpose(out, (0, 3, 1, 2))


# --------------------------------------------------------------------------
if __name__ == "__main__":
    key = jax.random.PRNGKey(0)
    k_out, k_low, k_par = jax.random.split(key, 3)

    batch = 2
    in_channels = 8            # backbone 'out' channels (real: 2048)
    low_level_channels = 4     # backbone 'low_level' channels (real: 256)
    num_classes = 3
    H, W = 16, 16              # 'out' spatial size
    Hl, Wl = 32, 32            # 'low_level' spatial size

    feature = {
        "out": jax.random.normal(k_out, (batch, in_channels, H, W), jnp.float32),
        "low_level": jax.random.normal(
            k_low, (batch, low_level_channels, Hl, Wl), jnp.float32),
    }
    params = init_deeplab_v3plus(k_par, in_channels, low_level_channels,
                                 num_classes)

    out = jax.block_until_ready(deeplab_head_v3plus_forward(feature, params))
    assert out.shape == (batch, num_classes, Hl, Wl), out.shape

    ref = jax.block_until_ready(ref_forward(feature, params))
    if not jnp.allclose(out, ref, rtol=5e-2, atol=5e-2):
        max_err = float(jnp.max(jnp.abs(out - ref)))
        ref_scale = float(jnp.max(jnp.abs(ref)))
        raise AssertionError(
            f"mismatch vs reference: max abs err={max_err}, ref scale={ref_scale}")

    print("KERNEL_OK")
</pallas_src>

<mosaic_0001>
module attributes {stable_mosaic.version = 11 : i64} {
  func.func @_low_proj_kernel(%arg0: i32, %arg1: i32, %arg2: memref<1x16x32x4xbf16, #tpu.memory_space<vmem>>, %arg3: memref<4x128xbf16, #tpu.memory_space<vmem>>, %arg4: memref<1x128xf32, #tpu.memory_space<vmem>>, %arg5: memref<1x128xf32, #tpu.memory_space<vmem>>, %arg6: memref<1x16x32x128xbf16, #tpu.memory_space<vmem>>) attributes {dimension_semantics = [#tpu.dimension_semantics<parallel>, #tpu.dimension_semantics<parallel>], iteration_bounds = array<i64: 2, 2>, scalar_prefetch = 0 : i64, scratch_operands = 0 : i64, tpu.core_type = #tpu.core_type<tc>, window_params = [{transform_indices = @transform_0, window_bounds = array<i64: 1, 16, 32, 4>}, {pipeline_mode = #tpu.pipeline_mode<synchronous>, transform_indices = @transform_1, window_bounds = array<i64: 4, 128>}, {pipeline_mode = #tpu.pipeline_mode<synchronous>, transform_indices = @transform_2, window_bounds = array<i64: 1, 128>}, {pipeline_mode = #tpu.pipeline_mode<synchronous>, transform_indices = @transform_3, window_bounds = array<i64: 1, 128>}, {transform_indices = @transform_4, window_bounds = array<i64: 1, 16, 32, 128>}]} {
    %c0 = arith.constant 0 : index
    %c0_0 = arith.constant 0 : index
    %c0_1 = arith.constant 0 : index
    %c0_2 = arith.constant 0 : index
    %0 = vector.load %arg2[%c0, %c0_0, %c0_1, %c0_2] : memref<1x16x32x4xbf16, #tpu.memory_space<vmem>>, vector<1x16x32x4xbf16>
    %1 = vector.shape_cast %0 : vector<1x16x32x4xbf16> to vector<16x32x4xbf16>
    %2 = vector.shape_cast %1 : vector<16x32x4xbf16> to vector<512x4xbf16>
    %c0_3 = arith.constant 0 : index
    %c0_4 = arith.constant 0 : index
    %3 = vector.load %arg3[%c0_3, %c0_4] : memref<4x128xbf16, #tpu.memory_space<vmem>>, vector<4x128xbf16>
    %cst = arith.constant dense<0.000000e+00> : vector<512x128xf32>
    %4 = tpu.matmul %2, %3, %cst {dimension_numbers = #tpu.dot_dimension_numbers<[1], [0], [0], [1], [0, 0, 1, 1], [], []>} : vector<512x4xbf16>, vector<4x128xbf16>, vector<512x128xf32> -> vector<512x128xf32>
    %c0_5 = arith.constant 0 : index
    %c0_6 = arith.constant 0 : index
    %5 = vector.load %arg4[%c0_5, %c0_6] : memref<1x128xf32, #tpu.memory_space<vmem>>, vector<1x128xf32>
    %6 = vector.broadcast %5 : vector<1x128xf32> to vector<512x128xf32>
    %7 = arith.mulf %4, %6 : vector<512x128xf32>
    %c0_7 = arith.constant 0 : index
    %c0_8 = arith.constant 0 : index
    %8 = vector.load %arg5[%c0_7, %c0_8] : memref<1x128xf32, #tpu.memory_space<vmem>>, vector<1x128xf32>
    %9 = vector.broadcast %8 : vector<1x128xf32> to vector<512x128xf32>
    %10 = arith.addf %7, %9 : vector<512x128xf32>
    %cst_9 = arith.constant 0.000000e+00 : f32
    %11 = vector.broadcast %cst_9 : f32 to vector<512x128xf32>
    %12 = arith.maximumf %10, %11 : vector<512x128xf32>
    %13 = vector.shape_cast %12 : vector<512x128xf32> to vector<1x16x32x128xf32>
    %14 = arith.truncf %13 : vector<1x16x32x128xf32> to vector<1x16x32x128xbf16>
    %c0_10 = arith.constant 0 : index
    %c0_11 = arith.constant 0 : index
    %c0_12 = arith.constant 0 : index
    %c0_13 = arith.constant 0 : index
    %15 = vector.load %arg6[%c0_10, %c0_11, %c0_12, %c0_13] : memref<1x16x32x128xbf16, #tpu.memory_space<vmem>>, vector<1x16x32x128xbf16>
    tpu.vector_store %arg6[%c0_10, %c0_11, %c0_12, %c0_13], %14 {strides = array<i32>} : memref<1x16x32x128xbf16, #tpu.memory_space<vmem>>, vector<1x16x32x128xbf16>,
    return
  }
  func.func @transform_0(%arg0: i32, %arg1: i32) -> (i32, i32, i32, i32) {
    %c0_i32 = arith.constant 0 : i32
    %c0_i32_0 = arith.constant 0 : i32
    %c0_i32_1 = arith.constant 0 : i32
    return %arg0, %arg1, %c0_i32, %c0_i32_0 : i32, i32, i32, i32
  }
  func.func @transform_1(%arg0: i32, %arg1: i32) -> (i32, i32) {
    %c0_i32 = arith.constant 0 : i32
    %c0_i32_0 = arith.constant 0 : i32
    %c0_i32_1 = arith.constant 0 : i32
    return %c0_i32, %c0_i32_0 : i32, i32
  }
  func.func @transform_2(%arg0: i32, %arg1: i32) -> (i32, i32) {
    %c0_i32 = arith.constant 0 : i32
    %c0_i32_0 = arith.constant 0 : i32
    %c0_i32_1 = arith.constant 0 : i32
    return %c0_i32, %c0_i32_0 : i32, i32
  }
  func.func @transform_3(%arg0: i32, %arg1: i32) -> (i32, i32) {
    %c0_i32 = arith.constant 0 : i32
    %c0_i32_0 = arith.constant 0 : i32
    %c0_i32_1 = arith.constant 0 : i32
    return %c0_i32, %c0_i32_0 : i32, i32
  }
  func.func @transform_4(%arg0: i32, %arg1: i32) -> (i32, i32, i32, i32) {
    %c0_i32 = arith.constant 0 : i32
    %c0_i32_0 = arith.constant 0 : i32
    %c0_i32_1 = arith.constant 0 : i32
    return %arg0, %arg1, %c0_i32, %c0_i32_0 : i32, i32, i32, i32
  }
}

</mosaic_0001>

<bundles_post_ra>
// kernel: tpu_custom_call.1
= control target key start
LH: loop header
LB: loop body
LE: loop exit
PB: predicated region body
PF: predicated region fallthrough
CT: control target
= control target key end

     0   :  { %9 = vsyncpa [#allocation3], 0  ;;  %s2591_s0 = inlined_call_operand.vmem [shape: bf16[2,32,32,4], index: 0, kind: input, shape index: {}]   ;;  %s2592_s1 = inlined_call_operand.vmem [shape: bf16[4,128], index: 1, kind: input, shape index: {}]   ;;  %s2593_s2 = inlined_call_operand.vmem [shape: f32[1,128], index: 2, kind: input, shape index: {}]   ;;  %s2594_s3 = inlined_call_operand.vmem [shape: f32[1,128], index: 3, kind: input, shape index: {}]   ;;  %s2595_s4 = inlined_call_operand.hbm [shape: bf16[2,32,32,128], index: 4, kind: output, shape index: {}]  }
   0x1   :  { %11 = vsyncpa [#allocation3 + $0x1], 0  ;;  %s2207_s15 = smov 0   ;;  %s2209_s16 = smov 0  }
   0x2   :  { %s2211_s17 = smov 0   ;;  %s2213_s18 = smov 0  }
   0x3   :  { %s2215_s19 = smov 0   ;;  %s2217_s20 = smov 0  }
   0x4   :  { %s2219_s21 = smov 0   ;;  %s2221_s22 = smov 0  }
   0x5 LB: > { %s1474_s23 = sadd.s32 4294967295, %s2177_s22   ;;  %s1475_s24 = sadd.s32 4294967294, %s2177_s22   ;;  %s2177_s22 = sphi %s2221_s22, %s17_s22   ;;  %s2173_s21 = sphi %s2219_s21, %s2604_s21   ;;  %s2169_s20 = sphi %s2217_s20, %s2603_s20   ;;  %s2165_s19 = sphi %s2215_s19, %s2602_s19   ;;  %s2161_s18 = sphi %s2213_s18, %s2601_s18   ;;  %s2157_s17 = sphi %s2211_s17, %s2600_s17   ;;  %s2153_s16 = sphi %s2209_s16, %s2599_s16   ;;  %s2149_s15 = sphi %s2207_s15, %s2598_s15  }
   0x6   : > { %s26_s25 = sadd.s32 1, %s2169_s20  ;;  %s29_s26 = sadd.s32 1, %s2173_s21 }
   0x7   : > { %p27_p0 = scmp.ge.s32.totalorder %s26_s25, 2  ;;  %p139_p1 = scmp.ne.s32.totalorder %s2157_s17, %s2153_s16 }
   0x8   : > { %p140_p2 = scmp.eq.s32.totalorder %s1474_s23, 3  ;;  %p145_p5 = scmp.ne.s32.totalorder %s2153_s16, %s2149_s15 }
   0x9   : > { %s2606_s25 = smov (%p27_p0, %s26_s25), 0  ;;  %s2608_s26 = smov (!%p27_p0, %s29_s26), %s2173_s21 }
   0xa   : > { %s125_s27 = ssub.s32 %s2169_s20, %s2606_s25  ;;  %p2258_p3 = por %p140_p2, %p139_p1 }
   0xb   : > { %p31_p4 = scmp.ge.s32.totalorder %s2608_s26, 2  ;;  %p146_p6 = scmp.eq.s32.totalorder %s1475_s24, 3 }
   0xc   : > { %p1478_p7 = scmp.ge.s32.totalorder %s2177_s22, 1  ;;  %p187_p9 = scmp.lt.s32.totalorder %s2177_s22, 5 }
   0xd   : > { %s2610_s26 = smov (%p31_p4, %s2608_s26), 0  ;;  %p2267_p8 = por %p146_p6, %p145_p5 }
   0xe   : > { %s124_s30 = ssub.s32 %s2173_s21, %s2610_s26  ;;  %s129_s5 = sadd.s32 1, %s2157_s17 }
   0xf   : > { %s126_s6 = sor.u32 %s125_s27, %s124_s30  ;;  %p188_p10 = pnand %p1478_p7, %p187_p9 }
  0x10   : > { %p127_p11 = scmp.eq.s32.totalorder %s126_s6, 0  ;;  %s1480_s10 = sshll.u32 (!%p188_p10), %s2161_s18, 4 }
  0x11   : > { %191 = sbr.rel (%p188_p10) target bundleno = 308 (0x134), region = 36  ;;  %p219_p12 = scmp.lt.s32.totalorder (!%p188_p10), %s2165_s19, 1 }
  0x12   : > { %s2276_s7 = scalar_select %p127_p11, %s2157_s17, %s129_s5  }
  0x13   : > { %p221_p13 = scmp.lt.s32.totalorder (!%p188_p10), %s1480_s10, 31  ;;  %s2179_s8 = smov (!%p188_p10), [#allocation2]  }
  0x14   : > { %s2089_s9 = sshll.u32 (!%p188_p10), %s2179_s8, 4  ;;  %s2090_s9 = int_to_ptr.vmem [resolvable:$false] %s2089_s9 }
  0x16   : > { %v295_v0 = vld [vmem:[%s2592_s1] sm:$0x3]  ;;  %vm553_vm0 = vcmask 1041408   ;;  %s220_s11 = scalar_select %p219_p12, %s2165_s19, 1  ;;  %vm456_vm1 = vcmask 31744  }
  0x17   : > { %1978 = vmatprep.subr.msk.bf16.mxu0 %vm553_vm0, %v295_v0  ;;  %1979 = vmatprep.subr.msk.bf16.mxu1 %vm553_vm0, %v295_v0  ;;  %v555_v1 = vsel %vm553_vm0, %v295_v0, 0  ;;  %s2612_s10 = smov (!%p221_p13, %s1480_s10), 31  ;;  %v2356_v34 = vld [vmem:[%s2593_s2] ss:$0 sm:$0xff] }
  0x18   : > { %1911 = vmatpush3.bf16.msra.mxu0 %v555_v1  ;;  %1977 = vmatpush3.bf16.msra.mxu1 %v555_v1  ;;  %s1482_s12 = sshll.u32 %s220_s11, 7  ;;  %s1481_s13 = sshll.u32 %s2612_s10, 2  ;;  %v2362_v38 = vld [vmem:[%s2594_s3] ss:$0 sm:$0xff] }
  0x19   : > { %s225_s14 = sadd.s32 %s1482_s12, %s1481_s13  ;;  %s215_s10 = sand.u32 1, %s2153_s16  }
  0x1a   : > { %s1483_s23 = sshll.u32 %s225_s14, 2  ;;  %s1479_s11 = sshll.u32 %s215_s10, 8 }
  0x1b   : > { %s2287_s30 = scalar_lea.vmem %s2591_s0, %s1483_s23  ;;  %s2386_s12 = scalar_lea.vmem [#allocation2], %s1479_s11 }
  0x1c   : > { %v2053_v2 = vld [vmem:[%s2287_s30] sm:$0xff]   ;;  %v2055_v4 = vld [vmem:[%s2287_s30 + $0x8] sm:$0xff]   ;;  %v2057_v6 = vld [vmem:[%s2287_s30 + $0x10] sm:$0xff]   ;;  %s1685_s13 = sshll.u32 %s2161_s18, 6  ;;  %s1617_s14 = sshll.u32 %s2165_s19, 7 }
  0x1d   : > { %v2054_v3 = vld [vmem:[%s2287_s30 + $0x80] sm:$0xff]   ;;  %1912 = vmatprep.mubr.msk.bf16.mxu0 %vm456_vm1, %v2053_v2  ;;  %v2056_v5 = vld [vmem:[%s2287_s30 + $0x88] sm:$0xff]   ;;  %v2058_v7 = vld [vmem:[%s2287_s30 + $0x90] sm:$0xff]   ;;  %s1386_s18 = sadd.s32 %s1685_s13, %s1617_s14  ;;  %s1389_s23 = sshll.u32 %s2386_s12, 4  ;;  %s2533_s23 = int_to_ptr.vmem [resolvable:$true] %s1389_s23 }
  0x1e   : > { %1944 = vmatprep.mubr.msk.bf16.mxu1 %vm456_vm1, %v2054_v3  ;;  %1913 = vmatmul.mubr.msk.bf16.vlgmr.msra.gmra.mxu0 %vm456_vm1, %v2055_v4  ;;  %v2059_v8 = vld [vmem:[%s2287_s30 + $0x18] sm:$0xff]   ;;  %v2061_v10 = vld [vmem:[%s2287_s30 + $0x20] sm:$0xff]   ;;  %v2063_v12 = vld [vmem:[%s2287_s30 + $0x28] sm:$0xff]   ;;  %s1618_s19 = sshll.u32 %s1386_s18, 6  ;;  %s2540_s5 = scalar_lea.sflag [#allocation3], %s215_s10 }
  0x1f   : > { %1945 = vmatmul.mubr.msk.bf16.vlgmr.msra.gmra.mxu1 %vm456_vm1, %v2056_v5  ;;  %1916 = vmatprep.mubr.msk.bf16.mxu0 %vm456_vm1, %v2057_v6  ;;  %v2060_v9 = vld [vmem:[%s2287_s30 + $0x98] sm:$0xff]   ;;  %v2062_v11 = vld [vmem:[%s2287_s30 + $0xa0] sm:$0xff]   ;;  %v2064_v13 = vld [vmem:[%s2287_s30 + $0xa8] sm:$0xff]   ;;  %s2085_s6 = scalar_lea.vmem %s2533_s23, 4096  ;;  %s2091_s11 = scalar_lea.vmem %s2090_s9, 8192 }
  0x20   : > { %1948 = vmatprep.mubr.msk.bf16.mxu1 %vm456_vm1, %v2058_v7  ;;  %v2065_v14 = vld [vmem:[%s2287_s30 + $0x30] sm:$0xff]   ;;  %v2067_v16 = vld [vmem:[%s2287_s30 + $0x38] sm:$0xff]   ;;  %v2069_v18 = vld [vmem:[%s2287_s30 + $0x40] sm:$0xff]   ;;  %p2086_p0 = scmp.ne.s32.totalorder %s2533_s23, %s2085_s6  ;;  %p2092_p4 = scmp.lt.s32.totalorder %s2533_s23, %s2090_s9 }
  0x21   : > { %v2066_v15 = vld [vmem:[%s2287_s30 + $0xb0] sm:$0xff]   ;;  %v2068_v17 = vld [vmem:[%s2287_s30 + $0xb8] sm:$0xff]   ;;  %v2070_v19 = vld [vmem:[%s2287_s30 + $0xc0] sm:$0xff]   ;;  %p2093_p5 = scmp.lt.s32.totalorder %s2091_s11, %s2085_s6 }
  0x22   : > { %v2071_v20 = vld [vmem:[%s2287_s30 + $0x48] sm:$0xff]   ;;  %v2073_v22 = vld [vmem:[%s2287_s30 + $0x50] sm:$0xff]   ;;  %v2075_v24 = vld [vmem:[%s2287_s30 + $0x58] sm:$0xff]   ;;  %p2087_p1 = pnand %p2086_p0, %p2258_p3 }
  0x23   : > { %v2072_v21 = vld [vmem:[%s2287_s30 + $0xc8] sm:$0xff]   ;;  %v2074_v23 = vld [vmem:[%s2287_s30 + $0xd0] sm:$0xff]   ;;  %v2076_v25 = vld [vmem:[%s2287_s30 + $0xd8] sm:$0xff]   ;;  %p2094_p6 = por %p2093_p5, %p2092_p4 }
  0x24   : > { %v2077_v26 = vld [vmem:[%s2287_s30 + $0x60] sm:$0xff]   ;;  %v2079_v28 = vld [vmem:[%s2287_s30 + $0x68] sm:$0xff]   ;;  %v2081_v30 = vld [vmem:[%s2287_s30 + $0x70] sm:$0xff]   ;;  %p2088_p2 = pneg %p2087_p1 }
  0x25   : > { %v2078_v27 = vld [vmem:[%s2287_s30 + $0xe0] sm:$0xff]   ;;  %v2080_v29 = vld [vmem:[%s2287_s30 + $0xe8] sm:$0xff]   ;;  %v2082_v31 = vld [vmem:[%s2287_s30 + $0xf0] sm:$0xff]  }
  0x26   : > { %1917 = vmatmul.mubr.msk.bf16.gmra.mxu0 %vm456_vm1, %v2059_v8  ;;  %v2083_v32 = vld [vmem:[%s2287_s30 + $0x78] sm:$0xff]   ;;  %p2095_p7 = pnand %p2094_p6, %p2088_p2 }
  0x27   : > { %1949 = vmatmul.mubr.msk.bf16.gmra.mxu1 %vm456_vm1, %v2060_v9  ;;  %1920 = vmatprep.mubr.msk.bf16.mxu0 %vm456_vm1, %v2061_v10  ;;  %v2084_v33 = vld [vmem:[%s2287_s30 + $0xf8] sm:$0xff]   ;;  %s2531_s30 = scalar_lea.hbm %s2595_s4, %s1618_s19 }
  0x28   : > { %1952 = vmatprep.mubr.msk.bf16.mxu1 %vm456_vm1, %v2062_v11 }
  0x2e   : > { %1921 = vmatmul.mubr.msk.bf16.gmra.mxu0 %vm456_vm1, %v2063_v12 }
  0x2f   : > { %1953 = vmatmul.mubr.msk.bf16.gmra.mxu1 %vm456_vm1, %v2064_v13  ;;  %1924 = vmatprep.mubr.msk.bf16.mxu0 %vm456_vm1, %v2065_v14 }
  0x30   : > { %1956 = vmatprep.mubr.msk.bf16.mxu1 %vm456_vm1, %v2066_v15 }
  0x36   : > { %1925 = vmatmul.mubr.msk.bf16.gmra.mxu0 %vm456_vm1, %v2067_v16 }
  0x37   : > { %1957 = vmatmul.mubr.msk.bf16.gmra.mxu1 %vm456_vm1, %v2068_v17  ;;  %1928 = vmatprep.mubr.msk.bf16.mxu0 %vm456_vm1, %v2069_v18 }
  0x38   : > { %1960 = vmatprep.mubr.msk.bf16.mxu1 %vm456_vm1, %v2070_v19 }
  0x3e   : > { %1929 = vmatmul.mubr.msk.bf16.gmra.mxu0 %vm456_vm1, %v2071_v20 }
  0x3f   : > { %1961 = vmatmul.mubr.msk.bf16.gmra.mxu1 %vm456_vm1, %v2072_v21  ;;  %1932 = vmatprep.mubr.msk.bf16.mxu0 %vm456_vm1, %v2073_v22 }
  0x40   : > { %1964 = vmatprep.mubr.msk.bf16.mxu1 %vm456_vm1, %v2074_v23 }
  0x46   : > { %1933 = vmatmul.mubr.msk.bf16.gmra.mxu0 %vm456_vm1, %v2075_v24 }
  0x47   : > { %1965 = vmatmul.mubr.msk.bf16.gmra.mxu1 %vm456_vm1, %v2076_v25  ;;  %1936 = vmatprep.mubr.msk.bf16.mxu0 %vm456_vm1, %v2077_v26 }
  0x48   : > { %1968 = vmatprep.mubr.msk.bf16.mxu1 %vm456_vm1, %v2078_v27 }
  0x4e   : > { %1937 = vmatmul.mubr.msk.bf16.gmra.mxu0 %vm456_vm1, %v2079_v28 }
  0x4f   : > { %1969 = vmatmul.mubr.msk.bf16.gmra.mxu1 %vm456_vm1, %v2080_v29  ;;  %1940 = vmatprep.mubr.msk.bf16.mxu0 %vm456_vm1, %v2081_v30 }
  0x50   : > { %1972 = vmatprep.mubr.msk.bf16.mxu1 %vm456_vm1, %v2082_v31 }
  0x56   : > { %1941 = vmatmul.mubr.msk.bf16.gmra.mxu0 %vm456_vm1, %v2083_v32 }
  0x57   : > { %1973 = vmatmul.mubr.msk.bf16.gmra.mxu1 %vm456_vm1, %v2084_v33 }
  0xde   : > { %v1914_v35 = vpop.f32.mrf.mxu0 }
  0xdf   : > { %v855_v36 = vmul.f32 %v1914_v35, %v2356_v34  ;;  %v1946_v37 = vpop.f32.mrf.mxu1 }
  0xe0   : > { %v887_v39 = vmul.f32 %v1946_v37, %v2356_v34  ;;  %v591_v40 = vpop.f32.mrf.mxu0 }
  0xe1   : > { %v853_v41 = vmul.f32 %v2356_v34, %v591_v40  ;;  %v719_v42 = vpop.f32.mrf.mxu1  ;;  %v926_v45 = vadd.f32 %v2362_v38, %v855_v36 }
  0xe2   : > { %v885_v43 = vmul.f32 %v2356_v34, %v719_v42  ;;  %v1915_v44 = vpop.f32.mrf.mxu0  ;;  %v958_v48 = vadd.f32 %v2362_v38, %v887_v39 }
  0xe3   : > { %v856_v46 = vmul.f32 %v1915_v44, %v2356_v34  ;;  %v1947_v47 = vpop.f32.mrf.mxu1  ;;  %v924_v51 = vadd.f32 %v2362_v38, %v853_v41  ;;  %v990_v59 = vmax.f32 %v926_v45, 0.0 }
  0xe4   : > { %v888_v49 = vmul.f32 %v1947_v47, %v2356_v34  ;;  %v594_v50 = vpop.f32.mrf.mxu0  ;;  %v956_v55 = vadd.f32 %v2362_v38, %v885_v43  ;;  %v1022_v0 = vmax.f32 %v958_v48, 0.0 }
  0xe5   : > { %v927_v52 = vadd.f32 %v2362_v38, %v856_v46  ;;  %v854_v53 = vmul.f32 %v2356_v34, %v594_v50  ;;  %v722_v54 = vpop.f32.mrf.mxu1  ;;  %v988_v5 = vmax.f32 %v924_v51, 0.0 }
  0xe6   : > { %v959_v56 = vadd.f32 %v2362_v38, %v888_v49  ;;  %v886_v57 = vmul.f32 %v2356_v34, %v722_v54  ;;  %v1918_v58 = vpop.f32.mrf.mxu0  ;;  %v1020_v10 = vmax.f32 %v956_v55, 0.0 }
  0xe7   : > { %v991_v60 = vmax.f32 %v927_v52, 0.0  ;;  %v925_v61 = vadd.f32 %v2362_v38, %v854_v53  ;;  %v859_v62 = vmul.f32 %v1918_v58, %v2356_v34  ;;  %v1950_v63 = vpop.f32.mrf.mxu1 }
  0xe8   : > { %v1023_v1 = vmax.f32 %v959_v56, 0.0  ;;  %v957_v2 = vadd.f32 %v2362_v38, %v886_v57  ;;  %v891_v3 = vmul.f32 %v1950_v63, %v2356_v34  ;;  %v607_v4 = vpop.f32.mrf.mxu0 }
  0xe9   : > { %v1694_v6 = vpack.c.bf16 %v991_v60, %v990_v59  ;;  %v989_v7 = vmax.f32 %v925_v61, 0.0  ;;  %v857_v8 = vmul.f32 %v2356_v34, %v607_v4  ;;  %v735_v9 = vpop.f32.mrf.mxu1  ;;  %v930_v16 = vadd.f32 %v2362_v38, %v859_v62 }
  0xea   : > { %v1774_v11 = vpack.c.bf16 %v1023_v1, %v1022_v0  ;;  %v1021_v12 = vmax.f32 %v957_v2, 0.0  ;;  %v889_v13 = vmul.f32 %v2356_v34, %v735_v9  ;;  %v1919_v14 = vpop.f32.mrf.mxu0  ;;  %v962_v20 = vadd.f32 %v2362_v38, %v891_v3 }
  0xeb   : > { %1846 = vst [vmem:[%s2386_s12 + $0x8] sm:$0xff] %v1694_v6   ;;  %v1689_v15 = vpack.c.bf16 %v989_v7, %v988_v5  ;;  %v860_v17 = vmul.f32 %v1919_v14, %v2356_v34  ;;  %v1951_v18 = vpop.f32.mrf.mxu1  ;;  %v928_v23 = vadd.f32 %v2362_v38, %v857_v8  ;;  %v994_v31 = vmax.f32 %v930_v16, 0.0 }
  0xec   : > { %1862 = vst [vmem:[%s2386_s12 + $0x88] sm:$0xff] %v1774_v11   ;;  %v1769_v19 = vpack.c.bf16 %v1021_v12, %v1020_v10  ;;  %v892_v21 = vmul.f32 %v1951_v18, %v2356_v34  ;;  %v610_v22 = vpop.f32.mrf.mxu0  ;;  %v960_v27 = vadd.f32 %v2362_v38, %v889_v13  ;;  %v1026_v37 = vmax.f32 %v962_v20, 0.0 }
  0xed   : > { %1690 = vst [vmem:[%s2386_s12] sm:$0xff] %v1689_v15   ;;  %v931_v24 = vadd.f32 %v2362_v38, %v860_v17  ;;  %v858_v25 = vmul.f32 %v2356_v34, %v610_v22  ;;  %v738_v26 = vpop.f32.mrf.mxu1  ;;  %v992_v43 = vmax.f32 %v928_v23, 0.0 }
  0xee   : > { %1861 = vst [vmem:[%s2386_s12 + $0x80] sm:$0xff] %v1769_v19   ;;  %v963_v28 = vadd.f32 %v2362_v38, %v892_v21  ;;  %v890_v29 = vmul.f32 %v2356_v34, %v738_v26  ;;  %v1922_v30 = vpop.f32.mrf.mxu0  ;;  %v1024_v48 = vmax.f32 %v960_v27, 0.0 }
  0xef   : > { %v995_v32 = vmax.f32 %v931_v24, 0.0  ;;  %v929_v33 = vadd.f32 %v2362_v38, %v858_v25  ;;  %v863_v35 = vmul.f32 %v1922_v30, %v2356_v34  ;;  %v1954_v36 = vpop.f32.mrf.mxu1 }
  0xf0   : > { %v1027_v39 = vmax.f32 %v963_v28, 0.0  ;;  %v961_v40 = vadd.f32 %v2362_v38, %v890_v29  ;;  %v895_v41 = vmul.f32 %v1954_v36, %v2356_v34  ;;  %v623_v42 = vpop.f32.mrf.mxu0 }
  0xf1   : > { %v1704_v44 = vpack.c.bf16 %v995_v32, %v994_v31  ;;  %v993_v45 = vmax.f32 %v929_v33, 0.0  ;;  %v861_v46 = vmul.f32 %v2356_v34, %v623_v42  ;;  %v751_v47 = vpop.f32.mrf.mxu1  ;;  %v934_v54 = vadd.f32 %v2362_v38, %v863_v35 }
  0xf2   : > { %v1784_v49 = vpack.c.bf16 %v1027_v39, %v1026_v37  ;;  %v1025_v50 = vmax.f32 %v961_v40, 0.0  ;;  %v893_v51 = vmul.f32 %v2356_v34, %v751_v47  ;;  %v1923_v52 = vpop.f32.mrf.mxu0  ;;  %v966_v58 = vadd.f32 %v2362_v38, %v895_v41 }
  0xf3   : > { %1848 = vst [vmem:[%s2386_s12 + $0x18] sm:$0xff] %v1704_v44   ;;  %v1699_v53 = vpack.c.bf16 %v993_v45, %v992_v43  ;;  %v864_v55 = vmul.f32 %v1923_v52, %v2356_v34  ;;  %v1955_v56 = vpop.f32.mrf.mxu1  ;;  %v932_v61 = vadd.f32 %v2362_v38, %v861_v46  ;;  %v998_v5 = vmax.f32 %v934_v54, 0.0 }
  0xf4   : > { %1864 = vst [vmem:[%s2386_s12 + $0x98] sm:$0xff] %v1784_v49   ;;  %v1779_v57 = vpack.c.bf16 %v1025_v50, %v1024_v48  ;;  %v896_v59 = vmul.f32 %v1955_v56, %v2356_v34  ;;  %v626_v60 = vpop.f32.mrf.mxu0  ;;  %v964_v1 = vadd.f32 %v2362_v38, %v893_v51  ;;  %v1030_v10 = vmax.f32 %v966_v58, 0.0 }
  0xf5   : > { %1847 = vst [vmem:[%s2386_s12 + $0x10] sm:$0xff] %v1699_v53   ;;  %v935_v62 = vadd.f32 %v2362_v38, %v864_v55  ;;  %v862_v63 = vmul.f32 %v2356_v34, %v626_v60  ;;  %v754_v0 = vpop.f32.mrf.mxu1  ;;  %v996_v15 = vmax.f32 %v932_v61, 0.0 }
  0xf6   : > { %1863 = vst [vmem:[%s2386_s12 + $0x90] sm:$0xff] %v1779_v57   ;;  %v967_v2 = vadd.f32 %v2362_v38, %v896_v59  ;;  %v894_v3 = vmul.f32 %v2356_v34, %v754_v0  ;;  %v1926_v4 = vpop.f32.mrf.mxu0  ;;  %v1028_v20 = vmax.f32 %v964_v1, 0.0 }
  0xf7   : > { %v999_v6 = vmax.f32 %v935_v62, 0.0  ;;  %v933_v7 = vadd.f32 %v2362_v38, %v862_v63  ;;  %v867_v8 = vmul.f32 %v1926_v4, %v2356_v34  ;;  %v1958_v9 = vpop.f32.mrf.mxu1 }
  0xf8   : > { %v1031_v11 = vmax.f32 %v967_v2, 0.0  ;;  %v965_v12 = vadd.f32 %v2362_v38, %v894_v3  ;;  %v899_v13 = vmul.f32 %v1958_v9, %v2356_v34  ;;  %v639_v14 = vpop.f32.mrf.mxu0 }
  0xf9   : > { %v1714_v16 = vpack.c.bf16 %v999_v6, %v998_v5  ;;  %v997_v17 = vmax.f32 %v933_v7, 0.0  ;;  %v865_v18 = vmul.f32 %v2356_v34, %v639_v14  ;;  %v767_v19 = vpop.f32.mrf.mxu1  ;;  %v938_v26 = vadd.f32 %v2362_v38, %v867_v8 }
  0xfa   : > { %v1794_v21 = vpack.c.bf16 %v1031_v11, %v1030_v10  ;;  %v1029_v22 = vmax.f32 %v965_v12, 0.0  ;;  %v897_v23 = vmul.f32 %v2356_v34, %v767_v19  ;;  %v1927_v24 = vpop.f32.mrf.mxu0  ;;  %v970_v30 = vadd.f32 %v2362_v38, %v899_v13 }
  0xfb   : > { %1850 = vst [vmem:[%s2386_s12 + $0x28] sm:$0xff] %v1714_v16   ;;  %v1709_v25 = vpack.c.bf16 %v997_v17, %v996_v15  ;;  %v868_v27 = vmul.f32 %v1927_v24, %v2356_v34  ;;  %v1959_v28 = vpop.f32.mrf.mxu1  ;;  %v936_v33 = vadd.f32 %v2362_v38, %v865_v18  ;;  %v1002_v43 = vmax.f32 %v938_v26, 0.0 }
  0xfc   : > { %1866 = vst [vmem:[%s2386_s12 + $0xa8] sm:$0xff] %v1794_v21   ;;  %v1789_v29 = vpack.c.bf16 %v1029_v22, %v1028_v20  ;;  %v900_v31 = vmul.f32 %v1959_v28, %v2356_v34  ;;  %v642_v32 = vpop.f32.mrf.mxu0  ;;  %v968_v39 = vadd.f32 %v2362_v38, %v897_v23  ;;  %v1034_v48 = vmax.f32 %v970_v30, 0.0 }
  0xfd   : > { %1849 = vst [vmem:[%s2386_s12 + $0x20] sm:$0xff] %v1709_v25   ;;  %v939_v35 = vadd.f32 %v2362_v38, %v868_v27  ;;  %v866_v36 = vmul.f32 %v2356_v34, %v642_v32  ;;  %v770_v37 = vpop.f32.mrf.mxu1  ;;  %v1000_v53 = vmax.f32 %v936_v33, 0.0 }
  0xfe   : > { %1865 = vst [vmem:[%s2386_s12 + $0xa0] sm:$0xff] %v1789_v29   ;;  %v971_v40 = vadd.f32 %v2362_v38, %v900_v31  ;;  %v898_v41 = vmul.f32 %v2356_v34, %v770_v37  ;;  %v1930_v42 = vpop.f32.mrf.mxu0  ;;  %v1032_v58 = vmax.f32 %v968_v39, 0.0 }
  0xff   : > { %v1003_v44 = vmax.f32 %v939_v35, 0.0  ;;  %v937_v45 = vadd.f32 %v2362_v38, %v866_v36  ;;  %v871_v46 = vmul.f32 %v1930_v42, %v2356_v34  ;;  %v1962_v47 = vpop.f32.mrf.mxu1 }
 0x100   : > { %v1035_v49 = vmax.f32 %v971_v40, 0.0  ;;  %v969_v50 = vadd.f32 %v2362_v38, %v898_v41  ;;  %v903_v51 = vmul.f32 %v1962_v47, %v2356_v34  ;;  %v655_v52 = vpop.f32.mrf.mxu0 }
 0x101   : > { %v1724_v54 = vpack.c.bf16 %v1003_v44, %v1002_v43  ;;  %v1001_v55 = vmax.f32 %v937_v45, 0.0  ;;  %v869_v56 = vmul.f32 %v2356_v34, %v655_v52  ;;  %v783_v57 = vpop.f32.mrf.mxu1  ;;  %v942_v0 = vadd.f32 %v2362_v38, %v871_v46 }
 0x102   : > { %v1804_v59 = vpack.c.bf16 %v1035_v49, %v1034_v48  ;;  %v1033_v60 = vmax.f32 %v969_v50, 0.0  ;;  %v901_v61 = vmul.f32 %v2356_v34, %v783_v57  ;;  %v1931_v62 = vpop.f32.mrf.mxu0  ;;  %v974_v4 = vadd.f32 %v2362_v38, %v903_v51 }
 0x103   : > { %1852 = vst [vmem:[%s2386_s12 + $0x38] sm:$0xff] %v1724_v54   ;;  %v1719_v63 = vpack.c.bf16 %v1001_v55, %v1000_v53  ;;  %v872_v1 = vmul.f32 %v1931_v62, %v2356_v34  ;;  %v1963_v2 = vpop.f32.mrf.mxu1  ;;  %v940_v7 = vadd.f32 %v2362_v38, %v869_v56  ;;  %v1006_v15 = vmax.f32 %v942_v0, 0.0 }
 0x104   : > { %1868 = vst [vmem:[%s2386_s12 + $0xb8] sm:$0xff] %v1804_v59   ;;  %v1799_v3 = vpack.c.bf16 %v1033_v60, %v1032_v58  ;;  %v904_v5 = vmul.f32 %v1963_v2, %v2356_v34  ;;  %v658_v6 = vpop.f32.mrf.mxu0  ;;  %v972_v11 = vadd.f32 %v2362_v38, %v901_v61  ;;  %v1038_v20 = vmax.f32 %v974_v4, 0.0 }
 0x105   : > { %1851 = vst [vmem:[%s2386_s12 + $0x30] sm:$0xff] %v1719_v63   ;;  %v943_v8 = vadd.f32 %v2362_v38, %v872_v1  ;;  %v870_v9 = vmul.f32 %v2356_v34, %v658_v6  ;;  %v786_v10 = vpop.f32.mrf.mxu1  ;;  %v1004_v25 = vmax.f32 %v940_v7, 0.0 }
 0x106   : > { %1867 = vst [vmem:[%s2386_s12 + $0xb0] sm:$0xff] %v1799_v3   ;;  %v975_v12 = vadd.f32 %v2362_v38, %v904_v5  ;;  %v902_v13 = vmul.f32 %v2356_v34, %v786_v10  ;;  %v1934_v14 = vpop.f32.mrf.mxu0  ;;  %v1036_v30 = vmax.f32 %v972_v11, 0.0 }
 0x107   : > { %v1007_v16 = vmax.f32 %v943_v8, 0.0  ;;  %v941_v17 = vadd.f32 %v2362_v38, %v870_v9  ;;  %v875_v18 = vmul.f32 %v1934_v14, %v2356_v34  ;;  %v1966_v19 = vpop.f32.mrf.mxu1 }
 0x108   : > { %v1039_v21 = vmax.f32 %v975_v12, 0.0  ;;  %v973_v22 = vadd.f32 %v2362_v38, %v902_v13  ;;  %v907_v23 = vmul.f32 %v1966_v19, %v2356_v34  ;;  %v671_v24 = vpop.f32.mrf.mxu0 }
 0x109   : > { %v1734_v26 = vpack.c.bf16 %v1007_v16, %v1006_v15  ;;  %v1005_v27 = vmax.f32 %v941_v17, 0.0  ;;  %v873_v28 = vmul.f32 %v2356_v34, %v671_v24  ;;  %v799_v29 = vpop.f32.mrf.mxu1  ;;  %v946_v37 = vadd.f32 %v2362_v38, %v875_v18 }
 0x10a   : > { %v1814_v31 = vpack.c.bf16 %v1039_v21, %v1038_v20  ;;  %v1037_v32 = vmax.f32 %v973_v22, 0.0  ;;  %v905_v33 = vmul.f32 %v2356_v34, %v799_v29  ;;  %v1935_v35 = vpop.f32.mrf.mxu0  ;;  %v978_v42 = vadd.f32 %v2362_v38, %v907_v23 }
 0x10b   : > { %1854 = vst [vmem:[%s2386_s12 + $0x48] sm:$0xff] %v1734_v26   ;;  %v1729_v36 = vpack.c.bf16 %v1005_v27, %v1004_v25  ;;  %v876_v39 = vmul.f32 %v1935_v35, %v2356_v34  ;;  %v1967_v40 = vpop.f32.mrf.mxu1  ;;  %v944_v45 = vadd.f32 %v2362_v38, %v873_v28  ;;  %v1010_v53 = vmax.f32 %v946_v37, 0.0 }
 0x10c   : > { %1870 = vst [vmem:[%s2386_s12 + $0xc8] sm:$0xff] %v1814_v31   ;;  %v1809_v41 = vpack.c.bf16 %v1037_v32, %v1036_v30  ;;  %v908_v43 = vmul.f32 %v1967_v40, %v2356_v34  ;;  %v674_v44 = vpop.f32.mrf.mxu0  ;;  %v976_v49 = vadd.f32 %v2362_v38, %v905_v33  ;;  %v1042_v58 = vmax.f32 %v978_v42, 0.0 }
 0x10d   : > { %1853 = vst [vmem:[%s2386_s12 + $0x40] sm:$0xff] %v1729_v36   ;;  %v947_v46 = vadd.f32 %v2362_v38, %v876_v39  ;;  %v874_v47 = vmul.f32 %v2356_v34, %v674_v44  ;;  %v802_v48 = vpop.f32.mrf.mxu1  ;;  %v1008_v63 = vmax.f32 %v944_v45, 0.0 }
 0x10e   : > { %1869 = vst [vmem:[%s2386_s12 + $0xc0] sm:$0xff] %v1809_v41   ;;  %v979_v50 = vadd.f32 %v2362_v38, %v908_v43  ;;  %v906_v51 = vmul.f32 %v2356_v34, %v802_v48  ;;  %v1938_v52 = vpop.f32.mrf.mxu0  ;;  %v1040_v4 = vmax.f32 %v976_v49, 0.0 }
 0x10f   : > { %v1011_v54 = vmax.f32 %v947_v46, 0.0  ;;  %v945_v55 = vadd.f32 %v2362_v38, %v874_v47  ;;  %v879_v56 = vmul.f32 %v1938_v52, %v2356_v34  ;;  %v1970_v57 = vpop.f32.mrf.mxu1 }
 0x110   : > { %v1043_v59 = vmax.f32 %v979_v50, 0.0  ;;  %v977_v60 = vadd.f32 %v2362_v38, %v906_v51  ;;  %v911_v61 = vmul.f32 %v1970_v57, %v2356_v34  ;;  %v687_v62 = vpop.f32.mrf.mxu0 }
 0x111   : > { %v1744_v0 = vpack.c.bf16 %v1011_v54, %v1010_v53  ;;  %v1009_v1 = vmax.f32 %v945_v55, 0.0  ;;  %v877_v2 = vmul.f32 %v2356_v34, %v687_v62  ;;  %v815_v3 = vpop.f32.mrf.mxu1  ;;  %v950_v10 = vadd.f32 %v2362_v38, %v879_v56 }
 0x112   : > { %v1824_v5 = vpack.c.bf16 %v1043_v59, %v1042_v58  ;;  %v1041_v6 = vmax.f32 %v977_v60, 0.0  ;;  %v909_v7 = vmul.f32 %v2356_v34, %v815_v3  ;;  %v1939_v8 = vpop.f32.mrf.mxu0  ;;  %v982_v14 = vadd.f32 %v2362_v38, %v911_v61 }
 0x113   : > { %1856 = vst [vmem:[%s2386_s12 + $0x58] sm:$0xff] %v1744_v0   ;;  %v1739_v9 = vpack.c.bf16 %v1009_v1, %v1008_v63  ;;  %v880_v11 = vmul.f32 %v1939_v8, %v2356_v34  ;;  %v1971_v12 = vpop.f32.mrf.mxu1  ;;  %v948_v17 = vadd.f32 %v2362_v38, %v877_v2  ;;  %v1014_v25 = vmax.f32 %v950_v10, 0.0 }
 0x114   : > { %1872 = vst [vmem:[%s2386_s12 + $0xd8] sm:$0xff] %v1824_v5   ;;  %v1819_v13 = vpack.c.bf16 %v1041_v6, %v1040_v4  ;;  %v912_v15 = vmul.f32 %v1971_v12, %v2356_v34  ;;  %v690_v16 = vpop.f32.mrf.mxu0  ;;  %v980_v21 = vadd.f32 %v2362_v38, %v909_v7  ;;  %v1046_v30 = vmax.f32 %v982_v14, 0.0 }
 0x115   : > { %1855 = vst [vmem:[%s2386_s12 + $0x50] sm:$0xff] %v1739_v9   ;;  %v951_v18 = vadd.f32 %v2362_v38, %v880_v11  ;;  %v878_v19 = vmul.f32 %v2356_v34, %v690_v16  ;;  %v818_v20 = vpop.f32.mrf.mxu1  ;;  %v1012_v36 = vmax.f32 %v948_v17, 0.0 }
 0x116   : > { %1871 = vst [vmem:[%s2386_s12 + $0xd0] sm:$0xff] %v1819_v13   ;;  %v983_v22 = vadd.f32 %v2362_v38, %v912_v15  ;;  %v910_v23 = vmul.f32 %v2356_v34, %v818_v20  ;;  %v1942_v24 = vpop.f32.mrf.mxu0  ;;  %v1044_v42 = vmax.f32 %v980_v21, 0.0 }
 0x117   : > { %v1015_v26 = vmax.f32 %v951_v18, 0.0  ;;  %v949_v27 = vadd.f32 %v2362_v38, %v878_v19  ;;  %v883_v28 = vmul.f32 %v1942_v24, %v2356_v34  ;;  %v1974_v29 = vpop.f32.mrf.mxu1 }
 0x118   : > { %v1047_v31 = vmax.f32 %v983_v22, 0.0  ;;  %v981_v32 = vadd.f32 %v2362_v38, %v910_v23  ;;  %v915_v33 = vmul.f32 %v1974_v29, %v2356_v34  ;;  %v703_v35 = vpop.f32.mrf.mxu0 }
 0x119   : > { %v1754_v37 = vpack.c.bf16 %v1015_v26, %v1014_v25  ;;  %v1013_v39 = vmax.f32 %v949_v27, 0.0  ;;  %v881_v40 = vmul.f32 %v2356_v34, %v703_v35  ;;  %v831_v41 = vpop.f32.mrf.mxu1  ;;  %v954_v48 = vadd.f32 %v2362_v38, %v883_v28 }
 0x11a   : > { %v1834_v43 = vpack.c.bf16 %v1047_v31, %v1046_v30  ;;  %v1045_v44 = vmax.f32 %v981_v32, 0.0  ;;  %v913_v45 = vmul.f32 %v2356_v34, %v831_v41  ;;  %v1943_v46 = vpop.f32.mrf.mxu0  ;;  %v986_v52 = vadd.f32 %v2362_v38, %v915_v33 }
 0x11b   : > { %1858 = vst [vmem:[%s2386_s12 + $0x68] sm:$0xff] %v1754_v37   ;;  %v1749_v47 = vpack.c.bf16 %v1013_v39, %v1012_v36  ;;  %v884_v49 = vmul.f32 %v1943_v46, %v2356_v34  ;;  %v1975_v50 = vpop.f32.mrf.mxu1  ;;  %v952_v55 = vadd.f32 %v2362_v38, %v881_v40  ;;  %v1018_v62 = vmax.f32 %v954_v48, 0.0 }
 0x11c   : > { %1874 = vst [vmem:[%s2386_s12 + $0xe8] sm:$0xff] %v1834_v43   ;;  %v1829_v51 = vpack.c.bf16 %v1045_v44, %v1044_v42  ;;  %v916_v53 = vmul.f32 %v1975_v50, %v2356_v34  ;;  %v706_v54 = vpop.f32.mrf.mxu0  ;;  %v984_v59 = vadd.f32 %v2362_v38, %v913_v45  ;;  %v1050_v1 = vmax.f32 %v986_v52, 0.0 }
 0x11d   : > { %1857 = vst [vmem:[%s2386_s12 + $0x60] sm:$0xff] %v1749_v47   ;;  %v955_v56 = vadd.f32 %v2362_v38, %v884_v49  ;;  %v882_v57 = vmul.f32 %v2356_v34, %v706_v54  ;;  %v834_v58 = vpop.f32.mrf.mxu1  ;;  %v1016_v4 = vmax.f32 %v952_v55, 0.0 }
 0x11e   : > { %1873 = vst [vmem:[%s2386_s12 + $0xe0] sm:$0xff] %v1829_v51   ;;  %v987_v60 = vadd.f32 %v2362_v38, %v916_v53  ;;  %v914_v61 = vmul.f32 %v2356_v34, %v834_v58  ;;  %v1048_v7 = vmax.f32 %v984_v59, 0.0 }
 0x11f   : > { %v1019_v63 = vmax.f32 %v955_v56, 0.0  ;;  %v953_v0 = vadd.f32 %v2362_v38, %v882_v57 }
 0x120   : > { %v1051_v2 = vmax.f32 %v987_v60, 0.0  ;;  %v985_v3 = vadd.f32 %v2362_v38, %v914_v61 }
 0x121   : > { %v1764_v5 = vpack.c.bf16 %v1019_v63, %v1018_v62  ;;  %v1017_v6 = vmax.f32 %v953_v0, 0.0 }
 0x122   : > { %v1844_v34 = vpack.c.bf16 %v1051_v2, %v1050_v1  ;;  %v1049_v8 = vmax.f32 %v985_v3, 0.0 }
 0x123   : > { %1860 = vst [vmem:[%s2386_s12 + $0x78] sm:$0xff] %v1764_v5   ;;  %v1759_v9 = vpack.c.bf16 %v1017_v6, %v1016_v4 }
 0x124   : > { %1876 = vst [vmem:[%s2386_s12 + $0xf8] sm:$0xff] %v1844_v34   ;;  %v1839_v38 = vpack.c.bf16 %v1049_v8, %v1048_v7 }
 0x125   : > { %1859 = vst [vmem:[%s2386_s12 + $0x70] sm:$0xff] %v1759_v9  }
 0x126   : > { %1875 = vst [vmem:[%s2386_s12 + $0xf0] sm:$0xff] %v1839_v38  }
 0x127   : > { %2098 = shalt.err (!%p2095_p7)
}
 0x128   : > { %s2099_s10 = scalar_lea.hbm %s2531_s30, 4096  ;;  %s2103_s14 = scalar_lea.hbm %s2595_s4, 16384 }
 0x129   : > { %p2100_p9 = scmp.ne.s32.totalorder %s2531_s30, %s2099_s10  ;;  %p2104_p12 = scmp.lt.s32.totalorder %s2531_s30, %s2595_s4 }
 0x12a   : > { %p2105_p13 = scmp.lt.s32.totalorder %s2103_s14, %s2099_s10 }
 0x12b   : > { %p2101_p10 = pnand %p2100_p9, %p2258_p3 }
 0x12c   : > { %p2106_p0 = por %p2105_p13, %p2104_p12 }
 0x12d   : > { %p2102_p11 = pneg %p2101_p10 }
 0x12f   : > { %p2107_p1 = pnand %p2106_p0, %p2102_p11 }
 0x131   : > { %2110 = shalt.err (!%p2107_p1)
}
 0x132   : > { %s2180_s24 = smov 64   ;;  %s2181_s27 = smov 4  }
 0x133   : > { %1980 = dma.vmem_to_hbm [thread:$0]  (%p2258_p3), %s2533_s23, 4096, %s2531_s30, %s2540_s5, %s2180_s24, %s2180_s24, %s2181_s27  }
 0x134 PF: > { %p1986_p2 = scmp.ge.s32.totalorder %s2177_s22, 2  ;;  %s1404_s6 = sand.u32 1, %s2149_s15  }
 0x135   : > { %s1405_s8 = scalar_lea.sflag [#allocation3], %s1404_s6 }
 0x136   : > { %p1983_p4 = pnand %p1986_p2, %p2267_p8 }
 0x138   : > { %p1984_p5 = pneg %p1983_p4 }
 0x13a   : > { %2144 = dma.done.wait (%p1984_p5), %s1405_s8, 4096  }
 0x13b   : > { %2146 = vsyncadd (%p1984_p5), %s1405_s8, 4294963200  ;;  %s17_s22 = sadd.s32 1, %s2177_s22   ;;  %s2598_s15 = smov %s2153_s16 }
 0x13c   : > { %p14_p6 = scmp.ge.s32.totalorder %s17_s22, 6   ;;  %s2599_s16 = smov %s2157_s17 }
 0x13d   : > { %s2600_s17 = smov %s2276_s7  ;;  %s2601_s18 = smov %s2169_s20 }
 0x13e   : > { %s2602_s19 = smov %s2173_s21  ;;  %s2603_s20 = smov %s2606_s25 }
 0x13f   : > { %s2604_s21 = smov %s2610_s26  ;;  %16 = sbr.rel (!%p14_p6) target bundleno = 5 (0x5), region = 71 }
 0x144   :  { %1410 = vsyncpa [#allocation3], 1 }
 0x145   :  { %1412 = vsyncpa [#allocation3 + $0x1], 1 }

</bundles_post_ra>
